<compile_context>
chip_gen: v6e
topology: v6e:2x2x1
jax: 0.10.0
libtpu: 0.0.40
codegen_flags: <defaults>
</compile_context>

<pallas_src>
import jax
import jax.numpy as jnp
from jax.experimental import pallas as pl
from jax.experimental.pallas import tpu as pltpu

HIDDEN = 128  # cells_layer1 in the PyTorch module


def _round_up(n, m):
    return ((n + m - 1) // m) * m


def dqn_s_kernel(x_ref, w1_ref, b1_ref, w2_ref, b2_ref, o_ref):
    # x_ref:  (tb, D)    f32  activations (streamed per batch tile, K = full dim)
    # w1_ref: (D, 128)   bf16 fc_1 weight (in,out layout), resident in VMEM
    # b1_ref: (1, 128)   f32  fc_1 bias
    # w2_ref: (128, O)   bf16 fc_2 weight (in,out layout), resident in VMEM
    # b2_ref: (1, O)     f32  fc_2 bias
    # o_ref:  (tb, O)    f32  output tile (narrow, full-dim last axis)
    x = x_ref[...].astype(jnp.bfloat16)  # in-kernel cast: no extra HBM copy
    h = jnp.dot(x, w1_ref[...], preferred_element_type=jnp.float32)
    h = h + b1_ref[...]
    # LeakyReLU(negative_slope=0.01) in f32 on the VPU.
    h = jnp.where(h >= 0, h, 0.01 * h)
    y = jnp.dot(h.astype(jnp.bfloat16), w2_ref[...],
                preferred_element_type=jnp.float32)
    o_ref[...] = y + b2_ref[...]


def _prepare_params(w1, b1, w2, b2):
    """Cast matmul operands to bf16; biases stay f32. No padding anywhere."""
    w1b = w1.astype(jnp.bfloat16)                       # (D, 128)
    b1r = b1.reshape(1, -1).astype(jnp.float32)         # (1, 128)
    w2b = w2.astype(jnp.bfloat16)                       # (128, O)
    b2r = b2.reshape(1, -1).astype(jnp.float32)         # (1, O)
    return w1b, b1r, w2b, b2r


def _choose_batch_tile(B, block_b):
    """Pick the batch tile.

    * cap at block_b (default 512: ~85% of HBM roofline vs ~29% at 128 rows),
    * guarantee >= 2 tiles when B is big enough so v7x megacore sharding of
      the "parallel" batch axis gives the second TensorCore work,
    * keep the tile a multiple of 8 (f32 sublane) unless it equals B.
    """
    if B <= 8:
        return B  # single full-dim block, grid=(1,)
    return min(block_b, _round_up(pl.cdiv(B, 2), 8))


def dqn_s_forward_batched(x_batch, w1, b1, w2, b2, *, block_b=512):
    """x_batch: (B, h, w) or (B, D) float32. Returns (B, outputs) float32."""
    B = x_batch.shape[0]
    x_flat = x_batch.reshape(B, -1).astype(jnp.float32)
    D = x_flat.shape[1]
    O = w2.shape[1]
    w1b, b1r, w2b, b2r = _prepare_params(w1, b1, w2, b2)

    tb = _choose_batch_tile(B, block_b)
    nb = pl.cdiv(B, tb)  # ragged last tile handled (masked) by Pallas

    out = pl.pallas_call(
        dqn_s_kernel,
        out_shape=jax.ShapeDtypeStruct((B, O), jnp.float32),
        grid_spec=pltpu.PrefetchScalarGridSpec(
            num_scalar_prefetch=0,
            grid=(nb,),
            in_specs=[
                pl.BlockSpec((tb, D), lambda i: (i, 0)),       # activations stream
                pl.BlockSpec((D, HIDDEN), lambda i: (0, 0)),   # weights resident
                pl.BlockSpec((1, HIDDEN), lambda i: (0, 0)),
                pl.BlockSpec((HIDDEN, O), lambda i: (0, 0)),
                pl.BlockSpec((1, O), lambda i: (0, 0)),
            ],
            out_specs=pl.BlockSpec((tb, O), lambda i: (i, 0)),
        ),
        compiler_params=pltpu.CompilerParams(
            # Shard batch tiles across TensorCores on v7x; no-op on v5e/v6e.
            dimension_semantics=("parallel",),
        ),
    )(x_flat, w1b, b1r, w2b, b2r)
    return out


def dqn_s_forward(x, w1, b1, w2, b2, *, use_pallas=True):
    """Single-sample path matching DQN_S.forward: x (h, w) -> (outputs,)."""
    # TODO(synk): at true B=1 the fixed pallas_call launch/pipeline overhead
    # dwarfs the ~100k FLOPs of work; fold multiple env steps into one
    # dqn_s_forward_batched call at the RL-loop level, or pass
    # use_pallas=False for the plain-XLA latency path.
    if not use_pallas:
        xf = x.reshape(-1).astype(jnp.float32)
        h = xf @ w1 + b1
        h = jnp.where(h >= 0, h, 0.01 * h)
        return h @ w2 + b2
    return dqn_s_forward_batched(x.reshape(1, -1), w1, b1, w2, b2)[0]


def init_params(key, h, w, outputs, hidden=HIDDEN):
    """Deterministic init mimicking torch.nn.Linear's U(-1/sqrt(fan_in), ...).

    Weights are stored (in, out) -- transpose torch checkpoints on import.
    """
    D = h * w
    k1, k2, k3, k4 = jax.random.split(key, 4)
    bound1 = 1.0 / jnp.sqrt(D)
    bound2 = 1.0 / jnp.sqrt(hidden)
    w1 = jax.random.uniform(k1, (D, hidden), jnp.float32, -bound1, bound1)
    b1 = jax.random.uniform(k2, (hidden,), jnp.float32, -bound1, bound1)
    w2 = jax.random.uniform(k3, (hidden, outputs), jnp.float32, -bound2, bound2)
    b2 = jax.random.uniform(k4, (outputs,), jnp.float32, -bound2, bound2)
    return w1, b1, w2, b2


if __name__ == "__main__":
    h, w, outputs = 8, 8, 4
    key = jax.random.PRNGKey(0)
    kx, kp, kb, kr = jax.random.split(key, 4)
    w1, b1, w2, b2 = init_params(kp, h, w, outputs)

    # References.
    def ref_f32(xf):
        h1 = xf @ w1 + b1
        h1 = jnp.where(h1 >= 0, h1, 0.01 * h1)
        return h1 @ w2 + b2

    def ref_bf16(xf):
        # Same bf16-rounded operands as the kernel, f32 accumulation.
        xq = xf.astype(jnp.bfloat16).astype(jnp.float32)
        w1q = w1.astype(jnp.bfloat16).astype(jnp.float32)
        w2q = w2.astype(jnp.bfloat16).astype(jnp.float32)
        h1 = xq @ w1q + b1
        h1 = jnp.where(h1 >= 0, h1, 0.01 * h1)
        h1q = h1.astype(jnp.bfloat16).astype(jnp.float32)
        return h1q @ w2q + b2

    # --- single-sample path (original module semantics) ---
    x = jax.random.normal(kx, (h, w), jnp.float32)
    y = dqn_s_forward(x, w1, b1, w2, b2)
    jax.block_until_ready(y)
    assert y.shape == (outputs,)
    xf = x.reshape(-1)
    assert jnp.allclose(y, ref_bf16(xf), atol=5e-3, rtol=5e-3)
    assert jnp.allclose(y, ref_f32(xf), atol=5e-2)

    # --- batched path, B a multiple of the tile ---
    B = 32
    xb = jax.random.normal(kb, (B, h, w), jnp.float32)
    yb = dqn_s_forward_batched(xb, w1, b1, w2, b2)
    jax.block_until_ready(yb)
    assert yb.shape == (B, outputs)
    xbf = xb.reshape(B, -1)
    assert jnp.allclose(yb, jax.vmap(ref_bf16)(xbf), atol=5e-3, rtol=5e-3)
    assert jnp.allclose(yb, jax.vmap(ref_f32)(xbf), atol=5e-2)

    # --- batched path, ragged last tile (B not a multiple of tb) ---
    Br = 37
    xr = jax.random.normal(kr, (Br, h, w), jnp.float32)
    yr = dqn_s_forward_batched(xr, w1, b1, w2, b2)
    jax.block_until_ready(yr)
    assert yr.shape == (Br, outputs)
    xrf = xr.reshape(Br, -1)
    assert jnp.allclose(yr, jax.vmap(ref_bf16)(xrf), atol=5e-3, rtol=5e-3)
    assert jnp.allclose(yr, jax.vmap(ref_f32)(xrf), atol=5e-2)

    print("KERNEL_OK")
</pallas_src>

<mosaic_0001>
module attributes {stable_mosaic.version = 11 : i64} {
  func.func @dqn_s_kernel(%arg0: i32, %arg1: memref<1x64xf32, #tpu.memory_space<vmem>>, %arg2: memref<64x128xbf16, #tpu.memory_space<vmem>>, %arg3: memref<1x128xf32, #tpu.memory_space<vmem>>, %arg4: memref<128x4xbf16, #tpu.memory_space<vmem>>, %arg5: memref<1x4xf32, #tpu.memory_space<vmem>>, %arg6: memref<1x4xf32, #tpu.memory_space<vmem>>) attributes {dimension_semantics = [#tpu.dimension_semantics<parallel>], iteration_bounds = array<i64: 1>, scalar_prefetch = 0 : i64, scratch_operands = 0 : i64, tpu.core_type = #tpu.core_type<tc>, window_params = [{transform_indices = @transform_0, window_bounds = array<i64: 1, 64>}, {pipeline_mode = #tpu.pipeline_mode<synchronous>, transform_indices = @transform_1, window_bounds = array<i64: 64, 128>}, {pipeline_mode = #tpu.pipeline_mode<synchronous>, transform_indices = @transform_2, window_bounds = array<i64: 1, 128>}, {pipeline_mode = #tpu.pipeline_mode<synchronous>, transform_indices = @transform_3, window_bounds = array<i64: 128, 4>}, {pipeline_mode = #tpu.pipeline_mode<synchronous>, transform_indices = @transform_4, window_bounds = array<i64: 1, 4>}, {transform_indices = @transform_5, window_bounds = array<i64: 1, 4>}]} {
    %c0 = arith.constant 0 : index
    %c0_0 = arith.constant 0 : index
    %0 = vector.load %arg1[%c0, %c0_0] : memref<1x64xf32, #tpu.memory_space<vmem>>, vector<1x64xf32>
    %1 = arith.truncf %0 : vector<1x64xf32> to vector<1x64xbf16>
    %c0_1 = arith.constant 0 : index
    %c0_2 = arith.constant 0 : index
    %2 = vector.load %arg2[%c0_1, %c0_2] : memref<64x128xbf16, #tpu.memory_space<vmem>>, vector<64x128xbf16>
    %cst = arith.constant dense<0.000000e+00> : vector<1x128xf32>
    %3 = tpu.matmul %1, %2, %cst {dimension_numbers = #tpu.dot_dimension_numbers<[1], [0], [0], [1], [0, 0, 1, 1], [], []>} : vector<1x64xbf16>, vector<64x128xbf16>, vector<1x128xf32> -> vector<1x128xf32>
    %c0_3 = arith.constant 0 : index
    %c0_4 = arith.constant 0 : index
    %4 = vector.load %arg3[%c0_3, %c0_4] : memref<1x128xf32, #tpu.memory_space<vmem>>, vector<1x128xf32>
    %5 = arith.addf %3, %4 : vector<1x128xf32>
    %cst_5 = arith.constant 0.000000e+00 : f32
    %6 = vector.broadcast %cst_5 : f32 to vector<1x128xf32>
    %7 = arith.cmpf oge, %5, %6 : vector<1x128xf32>
    %cst_6 = arith.constant 0.00999999977 : f32
    %8 = vector.broadcast %cst_6 : f32 to vector<1x128xf32>
    %9 = arith.mulf %8, %5 : vector<1x128xf32>
    %10 = arith.select %7, %5, %9 : vector<1x128xi1>, vector<1x128xf32>
    %11 = arith.truncf %10 : vector<1x128xf32> to vector<1x128xbf16>
    %c0_7 = arith.constant 0 : index
    %c0_8 = arith.constant 0 : index
    %12 = vector.load %arg4[%c0_7, %c0_8] : memref<128x4xbf16, #tpu.memory_space<vmem>>, vector<128x4xbf16>
    %cst_9 = arith.constant dense<0.000000e+00> : vector<1x4xf32>
    %13 = tpu.matmul %11, %12, %cst_9 {dimension_numbers = #tpu.dot_dimension_numbers<[1], [0], [0], [1], [0, 0, 1, 1], [], []>} : vector<1x128xbf16>, vector<128x4xbf16>, vector<1x4xf32> -> vector<1x4xf32>
    %c0_10 = arith.constant 0 : index
    %c0_11 = arith.constant 0 : index
    %14 = vector.load %arg5[%c0_10, %c0_11] : memref<1x4xf32, #tpu.memory_space<vmem>>, vector<1x4xf32>
    %15 = arith.addf %13, %14 : vector<1x4xf32>
    %c0_12 = arith.constant 0 : index
    %c0_13 = arith.constant 0 : index
    %16 = vector.load %arg6[%c0_12, %c0_13] : memref<1x4xf32, #tpu.memory_space<vmem>>, vector<1x4xf32>
    tpu.vector_store %arg6[%c0_12, %c0_13], %15 {strides = array<i32>} : memref<1x4xf32, #tpu.memory_space<vmem>>, vector<1x4xf32>,
    return
  }
  func.func @transform_0(%arg0: i32) -> (i32, i32) {
    %c0_i32 = arith.constant 0 : i32
    %c0_i32_0 = arith.constant 0 : i32
    return %arg0, %c0_i32 : i32, i32
  }
  func.func @transform_1(%arg0: i32) -> (i32, i32) {
    %c0_i32 = arith.constant 0 : i32
    %c0_i32_0 = arith.constant 0 : i32
    %c0_i32_1 = arith.constant 0 : i32
    return %c0_i32, %c0_i32_0 : i32, i32
  }
  func.func @transform_2(%arg0: i32) -> (i32, i32) {
    %c0_i32 = arith.constant 0 : i32
    %c0_i32_0 = arith.constant 0 : i32
    %c0_i32_1 = arith.constant 0 : i32
    return %c0_i32, %c0_i32_0 : i32, i32
  }
  func.func @transform_3(%arg0: i32) -> (i32, i32) {
    %c0_i32 = arith.constant 0 : i32
    %c0_i32_0 = arith.constant 0 : i32
    %c0_i32_1 = arith.constant 0 : i32
    return %c0_i32, %c0_i32_0 : i32, i32
  }
  func.func @transform_4(%arg0: i32) -> (i32, i32) {
    %c0_i32 = arith.constant 0 : i32
    %c0_i32_0 = arith.constant 0 : i32
    %c0_i32_1 = arith.constant 0 : i32
    return %c0_i32, %c0_i32_0 : i32, i32
  }
  func.func @transform_5(%arg0: i32) -> (i32, i32) {
    %c0_i32 = arith.constant 0 : i32
    %c0_i32_0 = arith.constant 0 : i32
    return %arg0, %c0_i32 : i32, i32
  }
}

</mosaic_0001>

<bundles_post_ra>
// kernel: tpu_custom_call.1
= control target key start
LH: loop header
LB: loop body
LE: loop exit
PB: predicated region body
PF: predicated region fallthrough
CT: control target
= control target key end

     0   :  { %v322_v1 = vmov 0.0   ;;  %vm323_vm0 = vmmov 0   ;;  %s403_s0 = inlined_call_operand.vmem [shape: f32[1,64], index: 0, kind: input, shape index: {}]   ;;  %s404_s1 = inlined_call_operand.vmem [shape: bf16[64,128], index: 1, kind: input, shape index: {}]   ;;  %s405_s2 = inlined_call_operand.vmem [shape: f32[1,128], index: 2, kind: input, shape index: {}]   ;;  %s406_s3 = inlined_call_operand.vmem [shape: bf16[128,4], index: 3, kind: input, shape index: {}]   ;;  %s407_s4 = inlined_call_operand.vmem [shape: f32[1,4], index: 4, kind: input, shape index: {}]   ;;  %s408_s5 = inlined_call_operand.hbm [shape: f32[1,4], index: 5, kind: output, shape index: {}]  }
   0x1   :  { %v288_v0 = vld [vmem:[%s404_s1 + $0x18] sm:$0xff]   ;;  %253 = vmatprep.subr.bf16.mxu0 %v322_v1  ;;  %265 = vmatprep.subr.bf16.mxu1 %v322_v1  ;;  %v289_v2 = vld [vmem:[%s404_s1 + $0x10] sm:$0xff]   ;;  %v290_v4 = vld [vmem:[%s404_s1 + $0x8] sm:$0xff]  }
   0x2   :  { %254 = vmatpush3.bf16.msra.mxu0 %v288_v0  ;;  %261 = vmatprep.mubr.msk.bf16.mxu0 %vm323_vm0, %v322_v1  ;;  %v292_v3 = vld [vmem:[%s406_s3 + $0x38] sm:$0xff]   ;;  %v293_v5 = vld [vmem:[%s406_s3 + $0x30] sm:$0xff]   ;;  %v291_v6 = vld [vmem:[%s404_s1] sm:$0xff]  }
   0x3   :  { %255 = vmatprep.subr.bf16.mxu0 %v322_v1  ;;  %281 = vmatprep.mubr.msk.bf16.mxu1 %vm323_vm0, %v322_v1  ;;  %v22_v7 = vld [vmem:[%s403_s0] sm:$0x1]  ;;  %v294_v8 = vld [vmem:[%s406_s3 + $0x28] sm:$0xff]  }
   0x4   :  { %266 = vmatpush3.bf16.msra.mxu1 %v292_v3 }
   0x5   :  { %267 = vmatprep.subr.bf16.mxu1 %v322_v1 }
   0x6   :  { %256 = vmatpush3.bf16.msra.mxu0 %v289_v2 }
   0x7   :  { %257 = vmatprep.subr.bf16.mxu0 %v322_v1 }
   0x8   :  { %268 = vmatpush3.bf16.msra.mxu1 %v293_v5 }
   0x9   :  { %269 = vmatprep.subr.bf16.mxu1 %v322_v1 }
   0xa   :  { %258 = vmatpush3.bf16.msra.mxu0 %v290_v4 }
   0xb   :  { %259 = vmatprep.subr.bf16.mxu0 %v322_v1 }
   0xc   :  { %10 = vsyncpa [#allocation3], 0  ;;  %v23_v9 = vpack.c.bf16 %v22_v7, %v22_v7  ;;  %vm57_vm1 = vcmask 523264   ;;  %270 = vmatpush3.bf16.msra.mxu1 %v294_v8  ;;  %v295_v10 = vld [vmem:[%s406_s3 + $0x20] sm:$0xff]   ;;  %v296_v11 = vld [vmem:[%s406_s3 + $0x18] sm:$0xff]   ;;  %vm210_vm3 = vcmask 24576  }
   0xd   :  { %271 = vmatprep.subr.bf16.mxu1 %v322_v1  ;;  %v297_v12 = vld [vmem:[%s406_s3 + $0x10] sm:$0xff]   ;;  %v298_v13 = vld [vmem:[%s406_s3 + $0x8] sm:$0xff]   ;;  %v299_v14 = vld [vmem:[%s406_s3] sm:$0xff]   ;;  %s324_s3 = smov [#allocation2]  }
   0xe   :  { %260 = vmatpush3.bf16.msra.mxu0 %v291_v6  ;;  %v32_v15 = vld [vmem:[%s405_s2] sm:$0x1]  ;;  %s218_s21 = sshll.u32 %s324_s3, 4  ;;  %s219_s21 = int_to_ptr.vmem [resolvable:$true] %s218_s21 }
   0xf   :  { %v121_v24 = vld [vmem:[%s407_s4] sm:$0x1]  ;;  %s300_s2 = scalar_lea.vmem %s219_s21, 16  ;;  %s304_s22 = scalar_lea.vmem %s219_s21, 32 }
  0x10   :  { %272 = vmatpush3.bf16.msra.mxu1 %v295_v10  ;;  %p301_p0 = scmp.ne.s32.totalorder %s219_s21, %s300_s2  ;;  %p305_p1 = scmp.lt.s32.totalorder %s219_s21, %s219_s21 }
  0x11   :  { %262 = vmatmul.mubr.msk.bf16.vlgmr.msra.gmra.mxu0 %vm57_vm1, %v23_v9  ;;  %273 = vmatprep.subr.bf16.mxu1 %v322_v1  ;;  %p306_p2 = scmp.lt.s32.totalorder %s304_s22, %s300_s2 }
  0x13   :  { %p307_p3 = por %p306_p2, %p305_p1 }
  0x14   :  { %274 = vmatpush3.bf16.msra.mxu1 %v296_v11 }
  0x15   :  { %275 = vmatprep.subr.bf16.mxu1 %v322_v1  ;;  %p308_p4 = pnand %p307_p3, %p301_p0 }
  0x18   :  { %276 = vmatpush3.bf16.msra.mxu1 %v297_v12 }
  0x19   :  { %277 = vmatprep.subr.bf16.mxu1 %v322_v1 }
  0x1c   :  { %278 = vmatpush3.bf16.msra.mxu1 %v298_v13 }
  0x1d   :  { %279 = vmatprep.subr.bf16.mxu1 %v322_v1 }
  0x20   :  { %280 = vmatpush3.bf16.msra.mxu1 %v299_v14 }
  0xd1   :  { %v95_v16 = vpop.f32.mrf.mxu0 }
  0xd2   :  { %v96_v17 = vadd.f32 %v95_v16, %v32_v15 }
  0xd3   :  { %v263_v18 = vpop.f32.mrf.mxu0 }
  0xd4   :  { %vm101_vm2 = vcmp.ge.f32.partialorder %v96_v17, 0.0  ;;  %v102_v19 = vmul.f32 0.01, %v96_v17 }
  0xd5   :  { %v98_v20 = vpop.f32.mrf.mxu0 }
  0xd6   :  { %v103_v21 = vsel %vm101_vm2, %v96_v17, %v102_v19 }
  0xd7   :  { %v264_v22 = vpop.f32.mrf.mxu0  ;;  %v104_v23 = vpack.c.bf16 %v103_v21, %v103_v21 }
  0xd9   :  { %282 = vmatmul.mubr.bf16.vlgmr.msra.gmra.mxu1 %v104_v23 }
 0x199   :  { %v204_v25 = vpop.f32.mrf.mxu1 }
 0x19a   :  { %v205_v26 = vadd.f32 %v204_v25, %v121_v24 }
 0x19b   :  { %v283_v27 = vpop.f32.mrf.mxu1 }
 0x19c   :  { %211 = vst.msk [vmem:[#allocation2] sm:$0x1] %vm210_vm3, %v205_v26 }
 0x19d   :  { %v207_v28 = vpop.f32.mrf.mxu1 }
 0x19e   :  { %311 = shalt.err (!%p308_p4)
}
 0x19f   :  { %221 = dma.vmem_to_hbm [thread:$0]  %s219_s21, 16, %s408_s5, [#allocation3]   ;;  %v284_v29 = vpop.f32.mrf.mxu1 }
 0x1a0   :  { %320 = dma.done.wait [#allocation3], 16  }
 0x1a1   :  { %321 = vsyncadd [#allocation3], 4294967280 }
 0x1a2   :  { %225 = vsyncpa [#allocation3], 1 }

</bundles_post_ra>
